<compile_context>
chip_gen: v7x
topology: tpu7x:2x2x1
jax: 0.10.0
libtpu: 0.0.40
codegen_flags: <defaults>
</compile_context>

<pallas_src>
import jax
import jax.numpy as jnp
import numpy as np
from jax import lax
from jax.experimental import pallas as pl
from jax.experimental.pallas import tpu as pltpu

# ----------------------------- hyperparameters ------------------------------
INPUT_DIM = 16
HIDDEN_DIM = 32
NUM_LAYERS = 2
OUTPUT_DIM = 8
FC1_DIM = 128
BATCH = 16             # demo batch: 2 row blocks -> exercises the grid
SEQ_LEN = 1            # forward() implies T*H == hidden_dim  =>  T == 1
NEG_SLOPE = 0.01       # nn.LeakyReLU() default negative_slope

LANES = 128            # packed-slab lane width: 4*H == FC1_DIM == 128
ROW_TILE = 8           # rows of x handled per grid step (one sublane group)
assert 4 * HIDDEN_DIM == LANES and FC1_DIM == LANES


def _round_up(n, m):
    return ((n + m - 1) // m) * m


# ------------------------ packed parameter layout ----------------------------
def _build_layout():
    """Row offsets of every segment inside the (total, 128) packed slab.
    Every segment starts on an 8-sublane boundary."""
    layout = {}
    row = 0
    for l in range(NUM_LAYERS):
        d_in = INPUT_DIM if l == 0 else HIDDEN_DIM
        layout[f"l{l}_w"] = row                      # [w_ih^T ; w_hh^T] (d_in+H, 4H)
        row += _round_up(d_in + HIDDEN_DIM, 8)
        layout[f"l{l}_b"] = row                      # b_ih + b_hh       (1, 4H)
        row += 8
    layout["fc1_w"] = row                            # fc1_w^T           (T*H, 128)
    row += _round_up(SEQ_LEN * HIDDEN_DIM, 8)
    layout["fc1_b"] = row
    row += 8
    layout["fc2_w"] = row                            # fc2_w (NOT transposed) (8, 128)
    row += _round_up(OUTPUT_DIM, 8)
    layout["fc2_b"] = row
    row += 8
    layout["total"] = row
    return layout


_LAYOUT = _build_layout()


def pack_params(lstm_params, fc1_w, fc1_b, fc2_w, fc2_b):
    """One-time (parameter-load-time) packing: transposes, bias fusion and
    padding are hoisted out of the per-call path."""
    L = _LAYOUT
    P = jnp.zeros((L["total"], LANES), jnp.float32)
    for l, (w_ih, w_hh, b_ih, b_hh) in enumerate(lstm_params):
        W = jnp.concatenate([jnp.transpose(w_ih), jnp.transpose(w_hh)], axis=0)
        off = L[f"l{l}_w"]
        P = P.at[off:off + W.shape[0], :].set(W.astype(jnp.float32))
        P = P.at[L[f"l{l}_b"], :].set((b_ih + b_hh).astype(jnp.float32))
    off = L["fc1_w"]
    P = P.at[off:off + fc1_w.shape[1], :].set(jnp.transpose(fc1_w).astype(jnp.float32))
    P = P.at[L["fc1_b"], :].set(fc1_b.astype(jnp.float32))
    off = L["fc2_w"]
    P = P.at[off:off + OUTPUT_DIM, :].set(fc2_w.astype(jnp.float32))      # (8, 128)
    P = P.at[L["fc2_b"], :OUTPUT_DIM].set(fc2_b.astype(jnp.float32))
    return P


# --------------------------------- kernel -----------------------------------
def _make_kernel(num_layers, seq_len, hidden_dim, input_dim, neg_slope):
    H = hidden_dim
    L = _LAYOUT

    def kernel(x_ref, p_ref, out_ref):
        rt = x_ref.shape[0]                                   # ROW_TILE

        # per-timestep inputs of the current layer (x block is (ROW_TILE, T*D_in))
        seq = [x_ref[:, t * input_dim:(t + 1) * input_dim] for t in range(seq_len)]

        # stacked LSTM (gate order i, f, g, o — PyTorch convention)
        for l in range(num_layers):
            d_in = input_dim if l == 0 else H
            w_off = L[f"l{l}_w"]
            w_ih = p_ref[w_off:w_off + d_in, :]               # (d_in, 4H)
            w_hh = p_ref[w_off + d_in:w_off + d_in + H, :]    # (H, 4H)
            b = p_ref[L[f"l{l}_b"]:L[f"l{l}_b"] + 1, :]       # (1, 4H)

            h = jnp.zeros((rt, H), jnp.float32)
            c = jnp.zeros((rt, H), jnp.float32)
            new_seq = []
            for t in range(seq_len):
                gates = jnp.dot(seq[t], w_ih,
                                preferred_element_type=jnp.float32) + b
                if t > 0:   # h == 0 at t == 0  ->  its matmul is exactly zero
                    gates = gates + jnp.dot(h, w_hh,
                                            preferred_element_type=jnp.float32)
                # full-width activations, then slice (2 EUP passes, not 4+2)
                sig = jax.nn.sigmoid(gates)                   # (rt, 4H)
                th = jnp.tanh(gates)                          # (rt, 4H)
                i_g = sig[:, 0 * H:1 * H]
                f_g = sig[:, 1 * H:2 * H]
                g_g = th[:, 2 * H:3 * H]
                o_g = sig[:, 3 * H:4 * H]
                c = f_g * c + i_g * g_g
                h = o_g * jnp.tanh(c)
                new_seq.append(h)
            seq = new_seq
        # TODO(synk): for T > 1, move x to timestep-major (T, B, D) tiles and a
        # fori_loop; fc1 only type-checks at T == 1 so this path is unused here.

        # lstm_out.contiguous().view(B, -1)  ->  (rt, T*H)
        flat = seq[0] if seq_len == 1 else jnp.concatenate(seq, axis=-1)

        # fc1 + LeakyReLU; nn.Dropout is identity at inference.
        # TODO(synk): training-mode RNG dropout (p=0.1) not implemented.
        fc1_w = p_ref[L["fc1_w"]:L["fc1_w"] + seq_len * H, :]
        fc1_b = p_ref[L["fc1_b"]:L["fc1_b"] + 1, :]
        h1 = jnp.dot(flat, fc1_w, preferred_element_type=jnp.float32) + fc1_b
        h1 = jnp.where(h1 > 0, h1, neg_slope * h1)

        # fc2: weight stored non-transposed (OUTPUT_DIM, 128); contract lane dims
        fc2_w = p_ref[L["fc2_w"]:L["fc2_w"] + OUTPUT_DIM, :]  # (8, 128)
        fc2_b = p_ref[L["fc2_b"]:L["fc2_b"] + 1, :]           # (1, 128), lanes>=8 zero
        out = lax.dot_general(h1, fc2_w,
                              dimension_numbers=(((1,), (1,)), ((), ())),
                              preferred_element_type=jnp.float32)   # (rt, 8)
        out = out + fc2_b[:, :OUTPUT_DIM]
        out_ref[...] = out.astype(out_ref.dtype)

    return kernel


# -------------------------------- wrapper ------------------------------------
@jax.jit
def lstm_forward_pallas(x, packed_params):
    """x: (B, T, D_in) f32.  packed_params: output of pack_params().
    Returns (B, OUTPUT_DIM)."""
    B, T, D = x.shape
    x2 = jnp.reshape(x, (B, T * D)).astype(jnp.float32)

    # only pad rows when B is not a whole number of row tiles (demo path: no pad)
    B_pad = _round_up(max(B, ROW_TILE), ROW_TILE)
    if B_pad != B:
        x2 = jnp.zeros((B_pad, T * D), jnp.float32).at[:B, :].set(x2)

    kernel = _make_kernel(NUM_LAYERS, T, HIDDEN_DIM, D, NEG_SLOPE)
    out = pl.pallas_call(
        kernel,
        out_shape=jax.ShapeDtypeStruct((B_pad, OUTPUT_DIM), jnp.float32),
        grid=(B_pad // ROW_TILE,),
        in_specs=[
            # x blocks pipeline along the request grid
            pl.BlockSpec((ROW_TILE, T * D), lambda i: (i, 0)),
            # weight slab: constant block index -> DMA'd once, VMEM-resident
            pl.BlockSpec((_LAYOUT["total"], LANES), lambda i: (0, 0)),
        ],
        out_specs=pl.BlockSpec((ROW_TILE, OUTPUT_DIM), lambda i: (i, 0)),
        compiler_params=pltpu.CompilerParams(
            dimension_semantics=("parallel",)),   # v7x: shard row blocks across TCs
    )(x2, packed_params)
    return out[:B]


# ------------------------- pure-JAX reference (check) ------------------------
def lstm_forward_ref(x, lstm_params, fc1_w, fc1_b, fc2_w, fc2_b):
    B, T, _ = x.shape
    H = HIDDEN_DIM
    seq = [x[:, t, :] for t in range(T)]
    for (w_ih, w_hh, b_ih, b_hh) in lstm_params:
        h = jnp.zeros((B, H), jnp.float32)
        c = jnp.zeros((B, H), jnp.float32)
        new_seq = []
        for t in range(T):
            gates = seq[t] @ w_ih.T + b_ih + h @ w_hh.T + b_hh
            i_g = jax.nn.sigmoid(gates[:, 0 * H:1 * H])
            f_g = jax.nn.sigmoid(gates[:, 1 * H:2 * H])
            g_g = jnp.tanh(gates[:, 2 * H:3 * H])
            o_g = jax.nn.sigmoid(gates[:, 3 * H:4 * H])
            c = f_g * c + i_g * g_g
            h = o_g * jnp.tanh(c)
            new_seq.append(h)
        seq = new_seq
    flat = seq[0] if T == 1 else jnp.concatenate(seq, axis=-1)
    h1 = flat @ fc1_w.T + fc1_b
    h1 = jnp.where(h1 > 0, h1, NEG_SLOPE * h1)
    return h1 @ fc2_w.T + fc2_b


# ----------------------------------- main ------------------------------------
if __name__ == "__main__":
    key = jax.random.PRNGKey(0)
    keys = jax.random.split(key, 4 * NUM_LAYERS + 5)

    def init(k, shape, scale):
        return jax.random.uniform(k, shape, jnp.float32, -scale, scale)

    s = 1.0 / np.sqrt(HIDDEN_DIM)
    lstm_params = []
    ki = 0
    for l in range(NUM_LAYERS):
        d_in = INPUT_DIM if l == 0 else HIDDEN_DIM
        w_ih = init(keys[ki + 0], (4 * HIDDEN_DIM, d_in), s)
        w_hh = init(keys[ki + 1], (4 * HIDDEN_DIM, HIDDEN_DIM), s)
        b_ih = init(keys[ki + 2], (4 * HIDDEN_DIM,), s)
        b_hh = init(keys[ki + 3], (4 * HIDDEN_DIM,), s)
        lstm_params.append((w_ih, w_hh, b_ih, b_hh))
        ki += 4

    fc1_w = init(keys[ki + 0], (FC1_DIM, HIDDEN_DIM * SEQ_LEN), 1.0 / np.sqrt(HIDDEN_DIM * SEQ_LEN))
    fc1_b = init(keys[ki + 1], (FC1_DIM,), 1.0 / np.sqrt(HIDDEN_DIM * SEQ_LEN))
    fc2_w = init(keys[ki + 2], (OUTPUT_DIM, FC1_DIM), 1.0 / np.sqrt(FC1_DIM))
    fc2_b = init(keys[ki + 3], (OUTPUT_DIM,), 1.0 / np.sqrt(FC1_DIM))

    x = jax.random.normal(keys[ki + 4], (BATCH, SEQ_LEN, INPUT_DIM), jnp.float32)

    # one-time parameter packing (transposes / bias fusion / padding hoisted here)
    packed = jax.block_until_ready(pack_params(lstm_params, fc1_w, fc1_b, fc2_w, fc2_b))

    out = lstm_forward_pallas(x, packed)
    out = jax.block_until_ready(out)

    ref = lstm_forward_ref(x, lstm_params, fc1_w, fc1_b, fc2_w, fc2_b)
    ref = jax.block_until_ready(ref)

    assert out.shape == (BATCH, OUTPUT_DIM)
    np.testing.assert_allclose(np.asarray(out), np.asarray(ref), rtol=1e-5, atol=1e-5)
    print("KERNEL_OK")
</pallas_src>

<mosaic_0001>
module attributes {stable_mosaic.version = 11 : i64} {
  func.func @kernel(%arg0: i32, %arg1: memref<8x16xf32, #tpu.memory_space<vmem>>, %arg2: memref<184x128xf32, #tpu.memory_space<vmem>>, %arg3: memref<8x8xf32, #tpu.memory_space<vmem>>) attributes {dimension_semantics = [#tpu.dimension_semantics<parallel>], iteration_bounds = array<i64: 2>, scalar_prefetch = 0 : i64, scratch_operands = 0 : i64, tpu.core_type = #tpu.core_type<tc>, window_params = [{transform_indices = @transform_0, window_bounds = array<i64: 8, 16>}, {pipeline_mode = #tpu.pipeline_mode<synchronous>, transform_indices = @transform_1, window_bounds = array<i64: 184, 128>}, {transform_indices = @transform_2, window_bounds = array<i64: 8, 8>}]} {
    %c0 = arith.constant 0 : index
    %c0_0 = arith.constant 0 : index
    %0 = vector.load %arg1[%c0, %c0_0] : memref<8x16xf32, #tpu.memory_space<vmem>>, vector<8x16xf32>
    %c0_1 = arith.constant 0 : index
    %c0_2 = arith.constant 0 : index
    %1 = vector.load %arg2[%c0_1, %c0_2] : memref<184x128xf32, #tpu.memory_space<vmem>>, vector<16x128xf32>
    %c48 = arith.constant 48 : index
    %c0_3 = arith.constant 0 : index
    %2 = vector.load %arg2[%c48, %c0_3] : memref<184x128xf32, #tpu.memory_space<vmem>>, vector<1x128xf32>
    %cst = arith.constant 0.000000e+00 : f32
    %3 = vector.broadcast %cst : f32 to vector<8x32xf32>
    %cst_4 = arith.constant dense<0.000000e+00> : vector<8x128xf32>
    %4 = tpu.matmul %0, %1, %cst_4 {dimension_numbers = #tpu.dot_dimension_numbers<[1], [0], [0], [1], [0, 0, 1, 1], [], []>} : vector<8x16xf32>, vector<16x128xf32>, vector<8x128xf32> -> vector<8x128xf32>
    %5 = vector.broadcast %2 : vector<1x128xf32> to vector<8x128xf32>
    %6 = arith.addf %4, %5 : vector<8x128xf32>
    %7 = arith.negf %6 : vector<8x128xf32>
    %8 = math.exp %7 : vector<8x128xf32>
    %cst_5 = arith.constant 1.000000e+00 : f32
    %9 = vector.broadcast %cst_5 : f32 to vector<8x128xf32>
    %10 = arith.addf %9, %8 : vector<8x128xf32>
    %11 = arith.divf %9, %10 : vector<8x128xf32>
    %12 = math.tanh %6 : vector<8x128xf32>
    %13 = vector.extract_strided_slice %11 {offsets = [0, 0], sizes = [8, 32], strides = [1, 1]} : vector<8x128xf32> to vector<8x32xf32>
    %14 = vector.extract_strided_slice %11 {offsets = [0, 32], sizes = [8, 32], strides = [1, 1]} : vector<8x128xf32> to vector<8x32xf32>
    %15 = vector.extract_strided_slice %12 {offsets = [0, 64], sizes = [8, 32], strides = [1, 1]} : vector<8x128xf32> to vector<8x32xf32>
    %16 = vector.extract_strided_slice %11 {offsets = [0, 96], sizes = [8, 32], strides = [1, 1]} : vector<8x128xf32> to vector<8x32xf32>
    %17 = arith.mulf %14, %3 : vector<8x32xf32>
    %18 = arith.mulf %13, %15 : vector<8x32xf32>
    %19 = arith.addf %17, %18 : vector<8x32xf32>
    %20 = math.tanh %19 : vector<8x32xf32>
    %21 = arith.mulf %16, %20 : vector<8x32xf32>
    %c56 = arith.constant 56 : index
    %c0_6 = arith.constant 0 : index
    %22 = vector.load %arg2[%c56, %c0_6] : memref<184x128xf32, #tpu.memory_space<vmem>>, vector<32x128xf32>
    %c120 = arith.constant 120 : index
    %c0_7 = arith.constant 0 : index
    %23 = vector.load %arg2[%c120, %c0_7] : memref<184x128xf32, #tpu.memory_space<vmem>>, vector<1x128xf32>
    %cst_8 = arith.constant 0.000000e+00 : f32
    %24 = vector.broadcast %cst_8 : f32 to vector<8x32xf32>
    %cst_9 = arith.constant dense<0.000000e+00> : vector<8x128xf32>
    %25 = tpu.matmul %21, %22, %cst_9 {dimension_numbers = #tpu.dot_dimension_numbers<[1], [0], [0], [1], [0, 0, 1, 1], [], []>} : vector<8x32xf32>, vector<32x128xf32>, vector<8x128xf32> -> vector<8x128xf32>
    %26 = vector.broadcast %23 : vector<1x128xf32> to vector<8x128xf32>
    %27 = arith.addf %25, %26 : vector<8x128xf32>
    %28 = arith.negf %27 : vector<8x128xf32>
    %29 = math.exp %28 : vector<8x128xf32>
    %cst_10 = arith.constant 1.000000e+00 : f32
    %30 = vector.broadcast %cst_10 : f32 to vector<8x128xf32>
    %31 = arith.addf %30, %29 : vector<8x128xf32>
    %32 = arith.divf %30, %31 : vector<8x128xf32>
    %33 = math.tanh %27 : vector<8x128xf32>
    %34 = vector.extract_strided_slice %32 {offsets = [0, 0], sizes = [8, 32], strides = [1, 1]} : vector<8x128xf32> to vector<8x32xf32>
    %35 = vector.extract_strided_slice %32 {offsets = [0, 32], sizes = [8, 32], strides = [1, 1]} : vector<8x128xf32> to vector<8x32xf32>
    %36 = vector.extract_strided_slice %33 {offsets = [0, 64], sizes = [8, 32], strides = [1, 1]} : vector<8x128xf32> to vector<8x32xf32>
    %37 = vector.extract_strided_slice %32 {offsets = [0, 96], sizes = [8, 32], strides = [1, 1]} : vector<8x128xf32> to vector<8x32xf32>
    %38 = arith.mulf %35, %24 : vector<8x32xf32>
    %39 = arith.mulf %34, %36 : vector<8x32xf32>
    %40 = arith.addf %38, %39 : vector<8x32xf32>
    %41 = math.tanh %40 : vector<8x32xf32>
    %42 = arith.mulf %37, %41 : vector<8x32xf32>
    %c128 = arith.constant 128 : index
    %c0_11 = arith.constant 0 : index
    %43 = vector.load %arg2[%c128, %c0_11] : memref<184x128xf32, #tpu.memory_space<vmem>>, vector<32x128xf32>
    %c160 = arith.constant 160 : index
    %c0_12 = arith.constant 0 : index
    %44 = vector.load %arg2[%c160, %c0_12] : memref<184x128xf32, #tpu.memory_space<vmem>>, vector<1x128xf32>
    %cst_13 = arith.constant dense<0.000000e+00> : vector<8x128xf32>
    %45 = tpu.matmul %42, %43, %cst_13 {dimension_numbers = #tpu.dot_dimension_numbers<[1], [0], [0], [1], [0, 0, 1, 1], [], []>} : vector<8x32xf32>, vector<32x128xf32>, vector<8x128xf32> -> vector<8x128xf32>
    %46 = vector.broadcast %44 : vector<1x128xf32> to vector<8x128xf32>
    %47 = arith.addf %45, %46 : vector<8x128xf32>
    %cst_14 = arith.constant 0.000000e+00 : f32
    %48 = vector.broadcast %cst_14 : f32 to vector<8x128xf32>
    %49 = arith.cmpf ogt, %47, %48 : vector<8x128xf32>
    %cst_15 = arith.constant 0.00999999977 : f32
    %50 = vector.broadcast %cst_15 : f32 to vector<8x128xf32>
    %51 = arith.mulf %50, %47 : vector<8x128xf32>
    %52 = arith.select %49, %47, %51 : vector<8x128xi1>, vector<8x128xf32>
    %c168 = arith.constant 168 : index
    %c0_16 = arith.constant 0 : index
    %53 = vector.load %arg2[%c168, %c0_16] : memref<184x128xf32, #tpu.memory_space<vmem>>, vector<8x128xf32>
    %c176 = arith.constant 176 : index
    %c0_17 = arith.constant 0 : index
    %54 = vector.load %arg2[%c176, %c0_17] : memref<184x128xf32, #tpu.memory_space<vmem>>, vector<1x128xf32>
    %cst_18 = arith.constant dense<0.000000e+00> : vector<8x8xf32>
    %55 = tpu.matmul %52, %53, %cst_18 {dimension_numbers = #tpu.dot_dimension_numbers<[1], [1], [0], [0], [0, 0, 1, 0], [], []>} : vector<8x128xf32>, vector<8x128xf32>, vector<8x8xf32> -> vector<8x8xf32>
    %56 = vector.extract_strided_slice %54 {offsets = [0, 0], sizes = [1, 8], strides = [1, 1]} : vector<1x128xf32> to vector<1x8xf32>
    %57 = vector.broadcast %56 : vector<1x8xf32> to vector<8x8xf32>
    %58 = arith.addf %55, %57 : vector<8x8xf32>
    %c0_19 = arith.constant 0 : index
    %c0_20 = arith.constant 0 : index
    %59 = vector.load %arg3[%c0_19, %c0_20] : memref<8x8xf32, #tpu.memory_space<vmem>>, vector<8x8xf32>
    tpu.vector_store %arg3[%c0_19, %c0_20], %58 {strides = array<i32>} : memref<8x8xf32, #tpu.memory_space<vmem>>, vector<8x8xf32>,
    return
  }
  func.func @transform_0(%arg0: i32) -> (i32, i32) {
    %c0_i32 = arith.constant 0 : i32
    %c0_i32_0 = arith.constant 0 : i32
    return %arg0, %c0_i32 : i32, i32
  }
  func.func @transform_1(%arg0: i32) -> (i32, i32) {
    %c0_i32 = arith.constant 0 : i32
    %c0_i32_0 = arith.constant 0 : i32
    %c0_i32_1 = arith.constant 0 : i32
    return %c0_i32, %c0_i32_0 : i32, i32
  }
  func.func @transform_2(%arg0: i32) -> (i32, i32) {
    %c0_i32 = arith.constant 0 : i32
    %c0_i32_0 = arith.constant 0 : i32
    return %arg0, %c0_i32 : i32, i32
  }
}

</mosaic_0001>

<bundles_post_ra>
// kernel: lstm_forward_pallas.1
= control target key start
LH: loop header
LB: loop body
LE: loop exit
PB: predicated region body
PF: predicated region fallthrough
CT: control target
= control target key end

     0   :  { %7 = vsyncpa [#allocation3], 0  ;;  %s1067_s0 = inlined_call_operand.hbm [shape: f32[16,16], index: 0, kind: input, shape index: {}]   ;;  %s1068_s1 = inlined_call_operand.hbm [shape: f32[184,128], index: 1, kind: input, shape index: {}]   ;;  %s1069_s2 = inlined_call_operand.vmem [shape: f32[16,8], index: 2, kind: output, shape index: {}]  }
   0x1   :  { %9 = vsyncpa [#allocation3 + $0x1], 0 }
   0x2   :  { %10 = vsyncpa [#allocation5], 0  ;;  %s909_s9 = smov 0   ;;  %s911_s10 = smov 0  }
   0x3   :  { %s913_s11 = smov 0   ;;  %s915_s12 = smov 0  }
   0x4 LB: > { %s928_s13 = sadd.s32 4294967295, %s883_s12   ;;  %p36_p0 = scmp.ne.s32.totalorder %s875_s10, %s871_s9  ;;  %s883_s12 = sphi %s915_s12, %s1084_s12   ;;  %s879_s11 = sphi %s913_s11, %s1083_s11   ;;  %s875_s10 = sphi %s911_s10, %s1082_s10   ;;  %s871_s9 = sphi %s909_s9, %s1081_s9  }
   0x5   : > { %p1070_p1 = scmp.eq.s32.totalorder %s928_s13, 0  ;;  %p630_p2 = scmp.ge.s32.totalorder %s883_s12, 1 }
   0x6   : > { %p94_p3 = scmp.lt.s32.totalorder %s883_s12, 3  ;;  %s885_s16 = smov [#allocation4]  }
   0x7   : > { %p936_p4 = por %p1070_p1, %p36_p0  ;;  %s106_s17 = sshll.u32 %s885_s16, 4  ;;  %s107_s17 = int_to_ptr.vmem [resolvable:$true] %s106_s17 }
   0x8   : > { %p940_p5 = pnand %p630_p2, %p94_p3  ;;  %s953_s19 = sadd.s32 1, %s883_s12  }
   0x9   : > { %s1073_s14 = scalar_select %p936_p4, 1, 0 }
   0xa   : > { %s1074_s15 = scalar_select %p940_p5, 1, 0 }
   0xb   : > { %p720_p6 = pneg %p940_p5  ;;  %s23_s20 = sadd.s32 1, %s879_s11 }
   0xc   : > { %s20_s21 = ssub.s32 %s883_s12, %s953_s19  ;;  %s787_s24 = scalar_lea.hbm %s1068_s1, 2944 }
   0xd   : > { %p948_p7 = pnand %p720_p6, %p1070_p1  ;;  %p788_p8 = scmp.ne.s32.totalorder %s1068_s1, %s787_s24 }
   0xe   : > { %p794_p12 = scmp.lt.u32.totalorder %s787_s24, %s1068_s1 }
   0xf   : > { %p789_p9 = pneg %p948_p7 }
  0x11   : > { %p790_p10 = pnand %p789_p9, %p788_p8 }
  0x13   : > { %p791_p11 = pneg %p790_p10 }
  0x15   : > { %p796_p13 = pnand %p794_p12, %p791_p11 }
  0x17   : > { %799 = shalt.err (!%p796_p13)
}
  0x18   : > { %s800_s29 = scalar_lea.vmem %s107_s17, 2944  ;;  %p808_p6 = scmp.lt.s32.totalorder %s107_s17, %s107_s17 }
  0x19   : > { %p801_p0 = scmp.ne.s32.totalorder %s107_s17, %s800_s29  ;;  %p809_p1 = scmp.lt.s32.totalorder %s800_s29, %s800_s29 }
  0x1b   : > { %p803_p2 = pnand %p801_p0, %p789_p9  ;;  %p810_p4 = por %p809_p1, %p808_p6 }
  0x1d   : > { %p804_p3 = pneg %p803_p2 }
  0x1f   : > { %p811_p5 = pnand %p810_p4, %p804_p3 }
  0x21   : > { %814 = shalt.err (!%p811_p5)
}
  0x22   : > { %s886_s30 = smov 128   ;;  %s887_s3 = smov 8  }
  0x23   : > { %723 = dma.hbm_to_vmem [thread:$0]  (!%p948_p7), %s1068_s1, 2944, %s107_s17, [#allocation5], %s886_s30, %s886_s30, %s887_s3  }
  0x24   : > { %p21_p8 = scmp.eq.s32.totalorder %s20_s21, 0  ;;  %p30_p9 = scmp.ne.s32.totalorder %s879_s11, %s875_s10 }
  0x25   : > { %p31_p1 = scmp.eq.s32.totalorder %s883_s12, 0  ;;  %p729_p4 = scmp.lt.s32.totalorder %s883_s12, 2 }
  0x26   : > { %s979_s6 = scalar_select %p21_p8, %s879_s11, %s23_s20  }
  0x27   : > { %p32_p5 = por %p31_p1, %p30_p9  ;;  %s120_s7 = sand.u32 1, %s879_s11  }
  0x28   : > { %s633_s8 = sshll.u32 %s120_s7, 3  ;;  %s634_s9 = sshll.u32 %s883_s12, 7 }
  0x29   : > { %s986_s23 = scalar_lea.hbm %s1067_s0, %s634_s9  ;;  %s124_s17 = scalar_lea.vmem [#allocation2], %s633_s8 }
  0x2a   : > { %s131_s18 = sshll.u32 %s124_s17, 4  ;;  %p990_p7 = pnand %p729_p4, %p32_p5  ;;  %s988_s18 = int_to_ptr.vmem [resolvable:$true] %s131_s18 }
  0x2b   : > { %s121_s12 = scalar_lea.sflag [#allocation3], %s120_s7  ;;  %s815_s21 = scalar_lea.hbm %s986_s23, 128 }
  0x2c   : > { %p816_p10 = scmp.ne.s32.totalorder %s986_s23, %s815_s21  ;;  %p817_p11 = pneg %p990_p7 }
  0x2d   : > { %s820_s26 = scalar_lea.hbm %s1067_s0, 256  ;;  %p821_p0 = scmp.lt.u32.totalorder %s986_s23, %s1067_s0 }
  0x2e   : > { %p818_p12 = pnand %p817_p11, %p816_p10  ;;  %p822_p2 = scmp.lt.u32.totalorder %s820_s26, %s815_s21 }
  0x2f   : > { %p824_p6 = scmp.lt.u32.totalorder %s815_s21, %s986_s23 }
  0x30   : > { %p819_p13 = pneg %p818_p12  ;;  %p823_p3 = por %p822_p2, %p821_p0 }
  0x32   : > { %p825_p8 = por %p824_p6, %p823_p3 }
  0x34   : > { %p826_p9 = pnand %p825_p8, %p819_p13 }
  0x36   : > { %829 = shalt.err (!%p826_p9)
}
  0x37   : > { %s830_s29 = scalar_lea.vmem %s988_s18, 128  ;;  %s888_s30 = smov [#allocation2]  }
  0x38   : > { %p831_p1 = scmp.ne.s32.totalorder %s988_s18, %s830_s29  ;;  %s835_s3 = sshll.u32 %s888_s30, 4  ;;  %s836_s3 = int_to_ptr.vmem [resolvable:$false] %s835_s3 }
  0x39   : > { %s837_s4 = scalar_lea.vmem %s836_s3, 256  ;;  %p838_p10 = scmp.lt.s32.totalorder %s988_s18, %s836_s3 }
  0x3a   : > { %p833_p4 = pnand %p831_p1, %p817_p11  ;;  %p839_p12 = scmp.lt.s32.totalorder %s837_s4, %s830_s29 }
  0x3c   : > { %p834_p5 = pneg %p833_p4  ;;  %p840_p0 = por %p839_p12, %p838_p10 }
  0x3e   : > { %p841_p2 = pnand %p840_p0, %p834_p5 }
  0x40   : > { %844 = shalt.err (!%p841_p2)
}
  0x41   : > { %727 = dma.hbm_to_vmem [thread:$0]  (!%p990_p7), %s986_s23, 128, %s988_s18, %s121_s12  }
  0x42   : > { %p1077_p13 = scmp.ne.s32.totalorder %s1074_s15, 0 }
  0x43   : > { %s142_s5 = sand.u32 (!%p1077_p13), 1, %s875_s10   ;;  %p1078_p11 = scmp.ne.s32.totalorder (!%p1077_p13), %s1073_s14, 0 }
  0x44   : > { %140 = sbr.rel (%p1077_p13) target bundleno = 1921 (0x781), region = 28  ;;  %s636_s7 = sshll.u32 (!%p1077_p13), %s142_s5, 3 }
  0x45   : > { %s143_s8 = scalar_lea.sflag (!%p1077_p13), [#allocation3], %s142_s5  ;;  %s146_s9 = scalar_lea.vmem (!%p1077_p13), [#allocation2], %s636_s7 }
  0x4b   : > { %862 = dma.done.wait (%p1078_p11), %s143_s8, 128  }
  0x4c   : > { %864 = vsyncadd (%p1078_p11), %s143_s8, 4294967168  ;;  %p1079_p3 = scmp.eq.s32.totalorder %s928_s13, 0 }
  0x4e   : > { %866 = dma.done.wait (%p1079_p3), [#allocation5], 2944   ;;  %p1080_p6 = pmov %p1079_p3 }
  0x4f   : > { %v889_v0 = vmov 0.0|0.0   ;;  %vm890_vm0 = vmmov 0   ;;  %v891_v1 = vmov 0.0   ;;  %v175_v2 = vld [vmem:[#allocation4] sm:$0xff]  ;;  %v176_v3 = vld [vmem:[#allocation4 + $0x8] sm:$0xff]  ;;  %v174_v5 = vld [vmem:[%s146_s9] sm:$0xff] }
  0x50   : > { %868 = vsyncadd (%p1080_p6), [#allocation5], 4294964352  ;;  %699 = vmatprep.subr.bf16.mxu0 %v889_v0  ;;  %669 = vmatprep.mubr.msk.f32.mxu0 %vm890_vm0, %v891_v1  ;;  %v700_v4 = vpack.c.bf16 %v176_v3, %v175_v2  ;;  %vm182_vm1 = vcmask 130048   ;;  %v639_v6 = vld [vmem:[#allocation4 + $0x30] ss:$0 sm:$0xff]  ;;  %s892_s14 = smov 64  }
  0x51   : > { %702 = vmatprep.subr.bf16.mxu1 %v889_v0  ;;  %680 = vmatprep.mubr.msk.f32.mxu1 %vm890_vm0, %v891_v1  ;;  %s893_s15 = smov 32   ;;  %v280_v20 = vld [vmem:[#allocation4 + $0x38] sm:$0xff]  ;;  %v281_v21 = vld [vmem:[#allocation4 + $0x40] sm:$0xff]  ;;  %v282_v22 = vld [vmem:[#allocation4 + $0x48] sm:$0xff]  ;;  %vm292_vm2 = vcmask 261120   ;;  %p170_p7 = scmp.lt.s32.totalorder %s928_s13, 1 }
  0x52   : > { %701 = vmatpush3.bf16.msra.mxu0 %v700_v4  ;;  %v703_v23 = vpack.c.bf16 %v281_v21, %v280_v20  ;;  %v283_v24 = vld [vmem:[#allocation4 + $0x50] sm:$0xff]  ;;  %v642_v30 = vld [vmem:[#allocation4 + $0x78] ss:$0 sm:$0xff]  ;;  %v389_v44 = vld [vmem:[#allocation4 + $0x80] sm:$0xff]  ;;  %vm552_vm4 = vcmask 64512  }
  0x53   : > { %708 = vmatprep.subr.bf16.mxu0 %v889_v0  ;;  %v706_v25 = vpack.c.bf16 %v283_v24, %v282_v22  ;;  %v390_v45 = vld [vmem:[#allocation4 + $0x88] sm:$0xff]  ;;  %v391_v46 = vld [vmem:[#allocation4 + $0x90] sm:$0xff]  ;;  %v392_v48 = vld [vmem:[#allocation4 + $0x98] sm:$0xff]  ;;  %s1086_s13 = smov (!%p170_p7, %s928_s13), 1 }
  0x54   : > { %704 = vmatpush3.bf16.msra.mxu1 %v703_v23  ;;  %v709_v47 = vpack.c.bf16 %v390_v45, %v389_v44  ;;  %v712_v49 = vpack.c.bf16 %v392_v48, %v391_v46  ;;  %v476_v54 = vld [vmem:[#allocation4 + $0xa8] sm:$0xff]  ;;  %v645_v55 = vld [vmem:[#allocation4 + $0xa0] ss:$0 sm:$0xff]  ;;  %s638_s16 = sshll.u32 %s1086_s13, 3  ;;  %v647_v61 = vld [vmem:[#allocation4 + $0xb0] ss:$0 sm:$0xff] }
  0x55   : > { %670 = vmatmul.mubr.msk.f32.vlgmr.msra.gmra.mrb[0].mxu0 %vm182_vm1, %v174_v5  ;;  %705 = vmatprep.subr.bf16.mxu1 %v889_v0  ;;  %s173_s17 = scalar_lea.vmem %s1069_s2, %s638_s16 }
  0x56   : > { %691 = vmatprep.mubr.msk.f32.mxu0 %vm890_vm0, %v891_v1  ;;  %710 = vmatpush3.bf16.msra.mxu0 %v709_v47 }
  0x57   : > { %711 = vmatprep.subr.bf16.mxu0 %v889_v0 }
  0x58   : > { %707 = vmatpush3.bf16.msra.mxu1 %v706_v25 }
  0x59   : > { %694 = vmatprep.subr.mxu1 %v891_v1 }
  0x5a   : > { %713 = vmatpush3.bf16.msra.mxu0 %v712_v49 }
 0x128   : > { %v252_v7 = vpop.f32.mrb[0].mxu0 }
 0x129   : > { %v253_v8 = vadd.f32 %v639_v6, %v252_v7  ;;  %v671_v9 = vpop.f32.mrb[1].mxu0 }
 0x12b   : > { %771 = vtanh.f32 %v253_v8  ;;  %v641_v11 = vmul.f32 -1.442695, %v253_v8 }
 0x12d   : > { %773 = vpow2.f32 %v641_v11 }
 0x135   : > { %v772_v10 = vpop.eup %771 }
 0x136   : > { %265 = vrot.lane.b32.xlu0 %v772_v10, %s892_s14 }
 0x137   : > { %v774_v12 = vpop.eup %773 }
 0x138   : > { %v259_v13 = vadd.f32 1.0, %v774_v12 }
 0x13a   : > { %775 = vrcp.f32 %v259_v13 }
 0x144   : > { %v776_v14 = vpop.eup %775 }
 0x145   : > { %v263_v17 = vmul.f32 0.0, %v776_v14 }
 0x1a8   : > { %v266_v15 = vpop.permute.xlu0 %265 }
 0x1a9   : > { %v268_v16 = vmul.f32 %v776_v14, %v266_v15 }
 0x1ab   : > { %270 = vrot.lane.b32.xlu0 %v268_v16, %s893_s15 }
 0x21d   : > { %v271_v18 = vpop.permute.xlu0 %270 }
 0x21e   : > { %v273_v19 = vadd.f32 %v271_v18, %v263_v17 }
 0x220   : > { %777 = vtanh.f32 %v273_v19 }
 0x22a   : > { %v778_v26 = vpop.eup %777 }
 0x22b   : > { %276 = vrot.lane.b32.xlu1 %v778_v26, %s892_s14 }
 0x29d   : > { %v277_v27 = vpop.permute.xlu1 %276 }
 0x29e   : > { %v279_v28 = vmul.f32 %v776_v14, %v277_v27 }
 0x2a0   : > { %290 = vrot.lane.b32.xlu1 %v279_v28, %s893_s15 }
 0x312   : > { %v291_v29 = vpop.permute.xlu1 %290 }
 0x313   : > { %681 = vmatmul.mubr.msk.f32.vlgmr.msra.gmra.mrb[0].mxu1 %vm292_vm2, %v291_v29 }
 0x314   : > { %696 = vmatprep.mubr.msk.f32.mxu1 %vm890_vm0, %v891_v1  ;;  %695 = vmatpush3.xpose.msra.mxu1 %v476_v54 }
 0x3e6   : > { %v361_v31 = vpop.f32.mrb[0].mxu1 }
 0x3e7   : > { %v362_v32 = vadd.f32 %v642_v30, %v361_v31  ;;  %v682_v33 = vpop.f32.mrb[1].mxu1 }
 0x3e9   : > { %779 = vtanh.f32 %v362_v32  ;;  %v644_v35 = vmul.f32 -1.442695, %v362_v32 }
 0x3eb   : > { %781 = vpow2.f32 %v644_v35 }
 0x3f3   : > { %v780_v34 = vpop.eup %779 }
 0x3f4   : > { %374 = vrot.lane.b32.xlu0 %v780_v34, %s892_s14 }
 0x3f5   : > { %v782_v36 = vpop.eup %781 }
 0x3f6   : > { %v368_v37 = vadd.f32 1.0, %v782_v36 }
 0x3f8   : > { %783 = vrcp.f32 %v368_v37 }
 0x402   : > { %v784_v38 = vpop.eup %783 }
 0x403   : > { %v372_v41 = vmul.f32 0.0, %v784_v38 }
 0x466   : > { %v375_v39 = vpop.permute.xlu0 %374 }
 0x467   : > { %v377_v40 = vmul.f32 %v784_v38, %v375_v39 }
 0x469   : > { %379 = vrot.lane.b32.xlu1 %v377_v40, %s893_s15 }
 0x4db   : > { %v380_v42 = vpop.permute.xlu1 %379 }
 0x4dc   : > { %v382_v43 = vadd.f32 %v380_v42, %v372_v41 }
 0x4de   : > { %785 = vtanh.f32 %v382_v43 }
 0x4e8   : > { %v786_v50 = vpop.eup %785 }
 0x4e9   : > { %385 = vrot.lane.b32.xlu0 %v786_v50, %s892_s14 }
 0x55b   : > { %v386_v51 = vpop.permute.xlu0 %385 }
 0x55c   : > { %v388_v52 = vmul.f32 %v784_v38, %v386_v51 }
 0x55e   : > { %399 = vrot.lane.b32.xlu1 %v388_v52, %s893_s15 }
 0x5d0   : > { %v400_v53 = vpop.permute.xlu1 %399 }
 0x5d1   : > { %692 = vmatmul.mubr.msk.f32.vlgmr.msra.gmra.mrb[2].mxu0 %vm292_vm2, %v400_v53 }
 0x6a4   : > { %v469_v56 = vpop.f32.mrb[2].mxu0 }
 0x6a5   : > { %v470_v57 = vadd.f32 %v645_v55, %v469_v56  ;;  %v693_v58 = vpop.f32.mrb[3].mxu0 }
 0x6a7   : > { %vm473_vm3 = vcmp.gt.f32.partialorder %v470_v57, 0.0  ;;  %v474_v59 = vmul.f32 0.01, %v470_v57 }
 0x6a9   : > { %v475_v60 = vsel %vm473_vm3, %v470_v57, %v474_v59 }
 0x6aa   : > { %697 = vmatmul.mubr.f32.vlgmr.msra.gmra.mrb[2].mxu1 %v475_v60 }
 0x77d   : > { %v548_v62 = vpop.f32.mrb[2].mxu1 }
 0x77e   : > { %v549_v63 = vadd.f32 %v647_v61, %v548_v62  ;;  %v698_v0 = vpop.f32.mrb[3].mxu1 }
 0x780   : > { %553 = vst.msk [vmem:[%s173_s17] sm:$0xff] %vm552_vm4, %v549_v63 }
 0x781 PF: > { %p13_p8 = scmp.ge.s32.totalorder %s953_s19, 4   ;;  %s1081_s9 = smov %s875_s10 }
 0x782   : > { %s1082_s10 = smov %s879_s11  ;;  %s1083_s11 = smov %s979_s6 }
 0x783   : > { %s1084_s12 = smov %s953_s19  ;;  %15 = sbr.rel (!%p13_p8) target bundleno = 4 (0x4), region = 72 }
 0x78a   :  { %573 = vsyncpa [#allocation3], 1 }
 0x78b   :  { %575 = vsyncpa [#allocation3 + $0x1], 1 }
 0x78c   :  { %576 = vsyncpa [#allocation5], 1 }

</bundles_post_ra>
